<compile_context>
chip_gen: v7x
topology: tpu7x:2x2x1
jax: 0.10.0
libtpu: 0.0.40
codegen_flags: <defaults>
</compile_context>

<pallas_src>
import functools
import math

import jax
import jax.numpy as jnp
from jax.experimental import pallas as pl
from jax.experimental.pallas import tpu as pltpu

LANE = 128


def _round_up(x, m):
    return ((x + m - 1) // m) * m


# ---------------------------------------------------------------------------
# Critic MLP kernel:  x -> [Linear -> ReLU]* -> Linear
# ---------------------------------------------------------------------------
def _critic_kernel(n_layers, compute_dtype, x_ref, *refs):
    """refs = [w0, b0, w1, b1, ..., w_{L-1}, b_{L-1}, out_ref].

    Weights are (in_pad, out_pad) in `compute_dtype`; biases are (1, out_pad) f32.
    Matmuls accumulate in f32 on the MXU; bias-add / ReLU stay in f32 and are cast
    back to `compute_dtype` only to feed the next matmul.
    """
    out_ref = refs[-1]
    h = x_ref[...]                                        # (bt, F_pad) compute_dtype
    for k in range(n_layers):
        w = refs[2 * k][...]
        b = refs[2 * k + 1][...]
        z = jnp.dot(h, w, preferred_element_type=jnp.float32) + b
        if k < n_layers - 1:
            z = jnp.maximum(z, 0.0)                       # ReLU in f32 (VPU)
            h = z.astype(compute_dtype)
        else:
            h = z                                         # final layer: no ReLU
    out_ref[...] = h.astype(out_ref.dtype)


def critic_forward(x, params, *, batch_tile=128, compute_dtype=jnp.float32):
    """Run one critic MLP.

    Returns a (B_pad, C_pad) f32 array: columns >= true output size are exactly
    zero (zero-padded weights/biases); rows >= true batch are padding and are
    masked out later in the SMILE kernel.
    """
    weights, biases = params["weights"], params["biases"]
    n_layers = len(weights)
    assert n_layers >= 1
    assert batch_tile % 8 == 0, "batch_tile must be a multiple of 8"

    B, F = x.shape
    B_pad = _round_up(B, batch_tile)
    F_pad = _round_up(F, LANE)
    C_pad = _round_up(weights[-1].shape[1], LANE)

    # Lane-dense zero padding; padded weight rows/cols are zero so padded
    # activation columns stay exactly zero through the whole network.
    x_p = jnp.zeros((B_pad, F_pad), compute_dtype).at[:B, :F].set(
        x.astype(compute_dtype))

    flat = []
    in_pad = F_pad
    for w, b in zip(weights, biases):
        fi, fo = w.shape
        out_pad = _round_up(fo, LANE)
        w_p = jnp.zeros((in_pad, out_pad), compute_dtype).at[:fi, :fo].set(
            w.astype(compute_dtype))
        b_p = jnp.zeros((1, out_pad), jnp.float32).at[0, :fo].set(
            b.astype(jnp.float32))
        flat += [w_p, b_p]
        in_pad = out_pad

    grid = (B_pad // batch_tile,)
    in_specs = [pl.BlockSpec((batch_tile, F_pad), lambda i: (i, 0))]
    for p in flat:
        # Full-array blocks with a constant block index: fetched once, reused
        # across every grid step.
        in_specs.append(pl.BlockSpec(p.shape, lambda i: (0, 0)))
    out_specs = pl.BlockSpec((batch_tile, C_pad), lambda i: (i, 0))

    # Explicit VMEM budget: double-buffered x/out tiles + (double-buffered)
    # params, with slack; capped at 64 MiB for v7x.
    param_bytes = sum(int(p.size) * p.dtype.itemsize for p in flat)
    tile_bytes = (batch_tile * F_pad * jnp.dtype(compute_dtype).itemsize
                  + batch_tile * C_pad * 4)
    vmem_limit = int(min(64 * 2**20,
                         max(32 * 2**20,
                             2 * (param_bytes + tile_bytes) + (4 << 20))))

    return pl.pallas_call(
        functools.partial(_critic_kernel, n_layers, compute_dtype),
        out_shape=jax.ShapeDtypeStruct((B_pad, C_pad), jnp.float32),
        grid_spec=pltpu.PrefetchScalarGridSpec(
            num_scalar_prefetch=0,
            grid=grid,
            in_specs=in_specs,
            out_specs=out_specs),
        compiler_params=pltpu.CompilerParams(
            dimension_semantics=("parallel",),
            vmem_limit_bytes=vmem_limit),
    )(x_p, *flat)


# ---------------------------------------------------------------------------
# Fused scores + SMILE reduction kernel
# ---------------------------------------------------------------------------
def _smile_kernel(n_valid, clip, x1_ref, x2_ref, mi_ref):
    a = x1_ref[...].astype(jnp.float32)                   # (B_pad, C_pad)
    b = x2_ref[...].astype(jnp.float32)
    # scores = a @ b.T ; padded critic columns are exactly zero so they add 0.
    scores = jax.lax.dot_general(
        a, b, dimension_numbers=(((1,), (1,)), ((), ())),
        preferred_element_type=jnp.float32)               # (B_pad, B_pad)

    bp = scores.shape[0]
    row = jax.lax.broadcasted_iota(jnp.int32, (bp, bp), 0)
    col = jax.lax.broadcasted_iota(jnp.int32, (bp, bp), 1)
    valid = (row < n_valid) & (col < n_valid)
    diag_mask = valid & (row == col)
    off_mask = valid & (row != col)

    # mean of the (unclipped) diagonal.
    diag_sum = jnp.sum(jnp.where(diag_mask, scores, 0.0), keepdims=True)

    # log-mean-exp over the off-diagonal of the clipped scores; since the
    # clipped values are <= clip, shifting by `clip` is numerically stable.
    clipped = jnp.clip(scores, -clip, clip)
    exp_sum = jnp.sum(jnp.where(off_mask, jnp.exp(clipped - clip), 0.0),
                      keepdims=True)
    log_mean_exp = clip + jnp.log(exp_sum) - math.log(n_valid * (n_valid - 1))

    mi_ref[...] = diag_sum / float(n_valid) - log_mean_exp


def smile_mi_from_critics(c1, c2, *, n_valid, clip):
    assert c1.shape == c2.shape
    B_pad, C_pad = c1.shape
    mi = pl.pallas_call(
        functools.partial(_smile_kernel, int(n_valid), float(clip)),
        out_shape=jax.ShapeDtypeStruct((1, 1), jnp.float32),
        grid_spec=pltpu.PrefetchScalarGridSpec(
            num_scalar_prefetch=0,
            grid=(1,),
            in_specs=[pl.BlockSpec((B_pad, C_pad), lambda i: (0, 0)),
                      pl.BlockSpec((B_pad, C_pad), lambda i: (0, 0))],
            out_specs=pl.BlockSpec((1, 1), lambda i: (0, 0))),
        compiler_params=pltpu.CompilerParams(
            dimension_semantics=("arbitrary",)),
    )(c1, c2)
    return mi[0, 0]


# ---------------------------------------------------------------------------
# End-to-end forward
# ---------------------------------------------------------------------------
def decoupled_smile_mi(x1, x2, params1, params2, clip, *,
                       batch_tile=128, compute_dtype=jnp.float32):
    assert x1.shape[0] == x2.shape[0], "SMILE requires matched batches"
    B = x1.shape[0]
    c1 = critic_forward(x1, params1, batch_tile=batch_tile,
                        compute_dtype=compute_dtype)
    c2 = critic_forward(x2, params2, batch_tile=batch_tile,
                        compute_dtype=compute_dtype)
    return smile_mi_from_critics(c1, c2, n_valid=B, clip=clip)


# ---------------------------------------------------------------------------
# Parameter init (PyTorch nn.Linear default init) + pure-JAX reference
# ---------------------------------------------------------------------------
def init_critic_params(key, feature_size, hidden_sizes, critic_output_size,
                       include_bias=True):
    """Weights stored kernel-ready as (in, out); biases as (out,)."""
    sizes = [feature_size] + list(hidden_sizes) + [critic_output_size]
    keys = jax.random.split(key, len(sizes) - 1)
    weights, biases = [], []
    for k, (fi, fo) in enumerate(zip(sizes[:-1], sizes[1:])):
        kw, kb = jax.random.split(keys[k])
        bound = 1.0 / math.sqrt(fi)
        w = jax.random.uniform(kw, (fo, fi), jnp.float32, -bound, bound)
        b = (jax.random.uniform(kb, (fo,), jnp.float32, -bound, bound)
             if include_bias else jnp.zeros((fo,), jnp.float32))
        weights.append(w.T)            # (in, out)
        biases.append(b)
    # TODO(synk): add_spec_norm=True (spectral_norm power-iteration weight
    # normalization) is not implemented; weights are used as-is.
    return {"weights": weights, "biases": biases}


def reference_critic(x, params, compute_dtype=jnp.float32):
    h = x
    n = len(params["weights"])
    for k, (w, b) in enumerate(zip(params["weights"], params["biases"])):
        z = jnp.dot(h.astype(compute_dtype), w.astype(compute_dtype),
                    preferred_element_type=jnp.float32) + b.astype(jnp.float32)
        h = jnp.maximum(z, 0.0) if k < n - 1 else z
    return h


def reference_mi(x1, x2, params1, params2, clip, compute_dtype=jnp.float32):
    c1 = reference_critic(x1, params1, compute_dtype)
    c2 = reference_critic(x2, params2, compute_dtype)
    scores = jnp.dot(c1, c2.T, preferred_element_type=jnp.float32)
    n = scores.shape[0]
    diag_mean = jnp.mean(jnp.diagonal(scores))
    clipped = jnp.clip(scores, -clip, clip)
    off = ~jnp.eye(n, dtype=bool)
    m = jnp.max(jnp.where(off, clipped, -jnp.inf))
    lse = m + jnp.log(jnp.sum(jnp.where(off, jnp.exp(clipped - m), 0.0)))
    log_mean_exp = lse - jnp.log(jnp.float32(n * (n - 1)))
    return diag_mean - log_mean_exp


if __name__ == "__main__":
    # Small shapes consistent with the module's forward; batch_tile=64 gives
    # 2 "parallel" grid steps so v7x's two TensorCores can split the work.
    batch = 128
    feature_size = 16
    critic_output_size = 8
    hidden_sizes_1 = [64, 64]
    hidden_sizes_2 = [32, 32]
    clip = 5.0

    key = jax.random.PRNGKey(0)
    k1, k2, kp1, kp2 = jax.random.split(key, 4)
    x1 = jax.random.normal(k1, (batch, feature_size), jnp.float32)
    x2 = jax.random.normal(k2, (batch, feature_size), jnp.float32)
    params1 = init_critic_params(kp1, feature_size, hidden_sizes_1, critic_output_size)
    params2 = init_critic_params(kp2, feature_size, hidden_sizes_2, critic_output_size)

    # --- f32 path: check critic + full MI against the pure-JAX reference ----
    c1 = jax.block_until_ready(
        critic_forward(x1, params1, batch_tile=64, compute_dtype=jnp.float32))
    c1_ref = reference_critic(x1, params1)
    assert bool(jnp.all(c1[:, critic_output_size:] == 0.0))     # zero-padded lanes
    assert bool(jnp.allclose(c1[:batch, :critic_output_size], c1_ref,
                             atol=5e-3, rtol=5e-2))

    mi = decoupled_smile_mi(x1, x2, params1, params2, clip,
                            batch_tile=64, compute_dtype=jnp.float32)
    mi = jax.block_until_ready(mi)
    ref = reference_mi(x1, x2, params1, params2, clip)
    assert mi.shape == () and bool(jnp.isfinite(mi))
    assert bool(jnp.allclose(mi, ref, atol=5e-3, rtol=5e-2)), (mi, ref)

    # --- bf16 weights/activations with f32 accumulation (v6e/v7x fast path) -
    mi_bf16 = decoupled_smile_mi(x1, x2, params1, params2, clip,
                                 batch_tile=64, compute_dtype=jnp.bfloat16)
    mi_bf16 = jax.block_until_ready(mi_bf16)
    ref_bf16 = reference_mi(x1, x2, params1, params2, clip,
                            compute_dtype=jnp.bfloat16)
    assert bool(jnp.isfinite(mi_bf16))
    assert bool(jnp.allclose(mi_bf16, ref_bf16, atol=1e-2, rtol=5e-2)), (mi_bf16, ref_bf16)

    print("KERNEL_OK")
</pallas_src>

<mosaic_0001>
module attributes {stable_mosaic.version = 11 : i64} {
  func.func @_critic_kernel(%arg0: i32, %arg1: memref<64x128xf32, #tpu.memory_space<vmem>>, %arg2: memref<128x128xf32, #tpu.memory_space<vmem>>, %arg3: memref<1x128xf32, #tpu.memory_space<vmem>>, %arg4: memref<128x128xf32, #tpu.memory_space<vmem>>, %arg5: memref<1x128xf32, #tpu.memory_space<vmem>>, %arg6: memref<128x128xf32, #tpu.memory_space<vmem>>, %arg7: memref<1x128xf32, #tpu.memory_space<vmem>>, %arg8: memref<64x128xf32, #tpu.memory_space<vmem>>) attributes {dimension_semantics = [#tpu.dimension_semantics<parallel>], iteration_bounds = array<i64: 2>, scalar_prefetch = 0 : i64, scratch_operands = 0 : i64, tpu.core_type = #tpu.core_type<tc>, window_params = [{transform_indices = @transform_0, window_bounds = array<i64: 64, 128>}, {pipeline_mode = #tpu.pipeline_mode<synchronous>, transform_indices = @transform_1, window_bounds = array<i64: 128, 128>}, {pipeline_mode = #tpu.pipeline_mode<synchronous>, transform_indices = @transform_2, window_bounds = array<i64: 1, 128>}, {pipeline_mode = #tpu.pipeline_mode<synchronous>, transform_indices = @transform_3, window_bounds = array<i64: 128, 128>}, {pipeline_mode = #tpu.pipeline_mode<synchronous>, transform_indices = @transform_4, window_bounds = array<i64: 1, 128>}, {pipeline_mode = #tpu.pipeline_mode<synchronous>, transform_indices = @transform_5, window_bounds = array<i64: 128, 128>}, {pipeline_mode = #tpu.pipeline_mode<synchronous>, transform_indices = @transform_6, window_bounds = array<i64: 1, 128>}, {transform_indices = @transform_7, window_bounds = array<i64: 64, 128>}]} {
    %c0 = arith.constant 0 : index
    %c0_0 = arith.constant 0 : index
    %0 = vector.load %arg1[%c0, %c0_0] : memref<64x128xf32, #tpu.memory_space<vmem>>, vector<64x128xf32>
    %c0_1 = arith.constant 0 : index
    %c0_2 = arith.constant 0 : index
    %1 = vector.load %arg2[%c0_1, %c0_2] : memref<128x128xf32, #tpu.memory_space<vmem>>, vector<128x128xf32>
    %c0_3 = arith.constant 0 : index
    %c0_4 = arith.constant 0 : index
    %2 = vector.load %arg3[%c0_3, %c0_4] : memref<1x128xf32, #tpu.memory_space<vmem>>, vector<1x128xf32>
    %cst = arith.constant dense<0.000000e+00> : vector<64x128xf32>
    %3 = tpu.matmul %0, %1, %cst {dimension_numbers = #tpu.dot_dimension_numbers<[1], [0], [0], [1], [0, 0, 1, 1], [], []>} : vector<64x128xf32>, vector<128x128xf32>, vector<64x128xf32> -> vector<64x128xf32>
    %4 = vector.broadcast %2 : vector<1x128xf32> to vector<64x128xf32>
    %5 = arith.addf %3, %4 : vector<64x128xf32>
    %cst_5 = arith.constant 0.000000e+00 : f32
    %6 = vector.broadcast %cst_5 : f32 to vector<64x128xf32>
    %7 = arith.maximumf %5, %6 : vector<64x128xf32>
    %c0_6 = arith.constant 0 : index
    %c0_7 = arith.constant 0 : index
    %8 = vector.load %arg4[%c0_6, %c0_7] : memref<128x128xf32, #tpu.memory_space<vmem>>, vector<128x128xf32>
    %c0_8 = arith.constant 0 : index
    %c0_9 = arith.constant 0 : index
    %9 = vector.load %arg5[%c0_8, %c0_9] : memref<1x128xf32, #tpu.memory_space<vmem>>, vector<1x128xf32>
    %cst_10 = arith.constant dense<0.000000e+00> : vector<64x128xf32>
    %10 = tpu.matmul %7, %8, %cst_10 {dimension_numbers = #tpu.dot_dimension_numbers<[1], [0], [0], [1], [0, 0, 1, 1], [], []>} : vector<64x128xf32>, vector<128x128xf32>, vector<64x128xf32> -> vector<64x128xf32>
    %11 = vector.broadcast %9 : vector<1x128xf32> to vector<64x128xf32>
    %12 = arith.addf %10, %11 : vector<64x128xf32>
    %cst_11 = arith.constant 0.000000e+00 : f32
    %13 = vector.broadcast %cst_11 : f32 to vector<64x128xf32>
    %14 = arith.maximumf %12, %13 : vector<64x128xf32>
    %c0_12 = arith.constant 0 : index
    %c0_13 = arith.constant 0 : index
    %15 = vector.load %arg6[%c0_12, %c0_13] : memref<128x128xf32, #tpu.memory_space<vmem>>, vector<128x128xf32>
    %c0_14 = arith.constant 0 : index
    %c0_15 = arith.constant 0 : index
    %16 = vector.load %arg7[%c0_14, %c0_15] : memref<1x128xf32, #tpu.memory_space<vmem>>, vector<1x128xf32>
    %cst_16 = arith.constant dense<0.000000e+00> : vector<64x128xf32>
    %17 = tpu.matmul %14, %15, %cst_16 {dimension_numbers = #tpu.dot_dimension_numbers<[1], [0], [0], [1], [0, 0, 1, 1], [], []>} : vector<64x128xf32>, vector<128x128xf32>, vector<64x128xf32> -> vector<64x128xf32>
    %18 = vector.broadcast %16 : vector<1x128xf32> to vector<64x128xf32>
    %19 = arith.addf %17, %18 : vector<64x128xf32>
    %c0_17 = arith.constant 0 : index
    %c0_18 = arith.constant 0 : index
    %20 = vector.load %arg8[%c0_17, %c0_18] : memref<64x128xf32, #tpu.memory_space<vmem>>, vector<64x128xf32>
    tpu.vector_store %arg8[%c0_17, %c0_18], %19 {strides = array<i32>} : memref<64x128xf32, #tpu.memory_space<vmem>>, vector<64x128xf32>,
    return
  }
  func.func @transform_0(%arg0: i32) -> (i32, i32) {
    %c0_i32 = arith.constant 0 : i32
    %c0_i32_0 = arith.constant 0 : i32
    return %arg0, %c0_i32 : i32, i32
  }
  func.func @transform_1(%arg0: i32) -> (i32, i32) {
    %c0_i32 = arith.constant 0 : i32
    %c0_i32_0 = arith.constant 0 : i32
    %c0_i32_1 = arith.constant 0 : i32
    return %c0_i32, %c0_i32_0 : i32, i32
  }
  func.func @transform_2(%arg0: i32) -> (i32, i32) {
    %c0_i32 = arith.constant 0 : i32
    %c0_i32_0 = arith.constant 0 : i32
    %c0_i32_1 = arith.constant 0 : i32
    return %c0_i32, %c0_i32_0 : i32, i32
  }
  func.func @transform_3(%arg0: i32) -> (i32, i32) {
    %c0_i32 = arith.constant 0 : i32
    %c0_i32_0 = arith.constant 0 : i32
    %c0_i32_1 = arith.constant 0 : i32
    return %c0_i32, %c0_i32_0 : i32, i32
  }
  func.func @transform_4(%arg0: i32) -> (i32, i32) {
    %c0_i32 = arith.constant 0 : i32
    %c0_i32_0 = arith.constant 0 : i32
    %c0_i32_1 = arith.constant 0 : i32
    return %c0_i32, %c0_i32_0 : i32, i32
  }
  func.func @transform_5(%arg0: i32) -> (i32, i32) {
    %c0_i32 = arith.constant 0 : i32
    %c0_i32_0 = arith.constant 0 : i32
    %c0_i32_1 = arith.constant 0 : i32
    return %c0_i32, %c0_i32_0 : i32, i32
  }
  func.func @transform_6(%arg0: i32) -> (i32, i32) {
    %c0_i32 = arith.constant 0 : i32
    %c0_i32_0 = arith.constant 0 : i32
    %c0_i32_1 = arith.constant 0 : i32
    return %c0_i32, %c0_i32_0 : i32, i32
  }
  func.func @transform_7(%arg0: i32) -> (i32, i32) {
    %c0_i32 = arith.constant 0 : i32
    %c0_i32_0 = arith.constant 0 : i32
    return %arg0, %c0_i32 : i32, i32
  }
}

</mosaic_0001>

<bundles_post_ra>
// kernel: tpu_custom_call.1
= control target key start
LH: loop header
LB: loop body
LE: loop exit
PB: predicated region body
PF: predicated region fallthrough
CT: control target
= control target key end

     0   :  { %12 = vsyncpa [#allocation3], 0  ;;  %s1830_s0 = inlined_call_operand.hbm [shape: f32[128,128], index: 0, kind: input, shape index: {}]   ;;  %s1831_s1 = inlined_call_operand.hbm [shape: f32[128,128], index: 1, kind: input, shape index: {}]   ;;  %s1832_s2 = inlined_call_operand.vmem [shape: f32[1,128], index: 2, kind: input, shape index: {}]   ;;  %s1833_s3 = inlined_call_operand.hbm [shape: f32[128,128], index: 3, kind: input, shape index: {}]   ;;  %s1834_s4 = inlined_call_operand.vmem [shape: f32[1,128], index: 4, kind: input, shape index: {}]   ;;  %s1835_s5 = inlined_call_operand.hbm [shape: f32[128,128], index: 5, kind: input, shape index: {}]   ;;  %s1836_s6 = inlined_call_operand.vmem [shape: f32[1,128], index: 6, kind: input, shape index: {}]   ;;  %s1837_s7 = inlined_call_operand.hbm [shape: f32[128,128], index: 7, kind: output, shape index: {}]  }
   0x1   :  { %14 = vsyncpa [#allocation3 + $0x1], 0 }
   0x2   :  { %15 = vsyncpa [#allocation6], 0 }
   0x3   :  { %16 = vsyncpa [#allocation9], 0 }
   0x4   :  { %17 = vsyncpa [#allocation4], 0 }
   0x5   :  { %19 = vsyncpa [#allocation4 + $0x1], 0  ;;  %s1536_s24 = smov 0   ;;  %s1538_s25 = smov 0  }
   0x6   :  { %s1540_s26 = smov 0   ;;  %s1542_s27 = smov 0  }
   0x7 LB: > { %s1557_s28 = sadd.s32 4294967295, %s1485_s27   ;;  %s875_s29 = sadd.s32 4294967294, %s1485_s27   ;;  %s1485_s27 = sphi %s1542_s27, %s1863_s27   ;;  %s1481_s26 = sphi %s1540_s26, %s1862_s26   ;;  %s1477_s25 = sphi %s1538_s25, %s1861_s25   ;;  %s1473_s24 = sphi %s1536_s24, %s1860_s24  }
   0x8   : > { %p45_p0 = scmp.ne.s32.totalorder %s1477_s25, %s1473_s24  ;;  %p1838_p1 = scmp.eq.s32.totalorder %s1557_s28, 0 }
   0x9   : > { %p201_p3 = scmp.eq.s32.totalorder %s875_s29, 1  ;;  %p876_p5 = scmp.ge.s32.totalorder %s1485_s27, 1 }
   0xa   : > { %p1566_p4 = por %p1838_p1, %p45_p0  ;;  %p208_p7 = scmp.lt.s32.totalorder %s1485_s27, 3 }
   0xb   : > { %p1571_p6 = por %p201_p3, %p45_p0  ;;  %s1487_s10 = smov [#allocation5]  }
   0xc   : > { %s1842_s30 = scalar_select %p1566_p4, 1, 0 }
   0xd   : > { %s1843_s8 = scalar_select %p1571_p6, 1, 0 }
   0xe   : > { %p1576_p8 = pnand %p876_p5, %p208_p7  ;;  %s220_s11 = sshll.u32 %s1487_s10, 4  ;;  %s1580_s11 = int_to_ptr.vmem [resolvable:$true] %s220_s11 }
   0xf   : > { %1844 = sst [smem:[#allocation15_spill]] %s1843_s8  ;;  %s1488_s13 = smov [#allocation7]  }
  0x10   : > { %s1845_s9 = scalar_select %p1576_p8, 1, 0 }
  0x11   : > { %p1232_p9 = pneg %p1576_p8  ;;  %s236_s14 = sshll.u32 %s1488_s13, 4  ;;  %s1591_s14 = int_to_ptr.vmem [resolvable:$true] %s236_s14 }
  0x12   : > { %s1489_s15 = smov [#allocation8]   ;;  %s1297_s19 = scalar_lea.hbm %s1831_s1, 2048 }
  0x13   : > { %p1587_p11 = pnand %p1232_p9, %p1838_p1  ;;  %s1593_s16 = sshll.u32 %s1489_s15, 4  ;;  %s253_s16 = int_to_ptr.vmem [resolvable:$true] %s1593_s16 }
  0x14   : > { %p1298_p12 = scmp.ne.s32.totalorder %s1831_s1, %s1297_s19  ;;  %p1304_p5 = scmp.lt.u32.totalorder %s1297_s19, %s1831_s1 }
  0x15   : > { %p1603_p13 = pneg %p1587_p11 }
  0x17   : > { %p1300_p0 = pnand %p1603_p13, %p1298_p12 }
  0x19   : > { %p1301_p3 = pneg %p1300_p0 }
  0x1b   : > { %p1306_p7 = pnand %p1304_p5, %p1301_p3 }
  0x1d   : > { %1309 = shalt.err (!%p1306_p7)
}
  0x1e   : > { %s1310_s10 = scalar_lea.vmem %s1580_s11, 2048  ;;  %p1318_p2 = scmp.lt.s32.totalorder %s1580_s11, %s1580_s11 }
  0x1f   : > { %p1311_p9 = scmp.ne.s32.totalorder %s1580_s11, %s1310_s10  ;;  %p1319_p6 = scmp.lt.s32.totalorder %s1310_s10, %s1310_s10 }
  0x21   : > { %p1313_p10 = pnand %p1311_p9, %p1603_p13  ;;  %p1320_p12 = por %p1319_p6, %p1318_p2 }
  0x23   : > { %p1314_p1 = pneg %p1313_p10 }
  0x25   : > { %p1321_p0 = pnand %p1320_p12, %p1314_p1 }
  0x27   : > { %1324 = shalt.err (!%p1321_p0)
}
  0x28   : > { %s1490_s13 = smov 128   ;;  %s1491_s15 = smov 8  }
  0x29   : > { %1235 = dma.hbm_to_vmem [thread:$0]  (!%p1587_p11), %s1831_s1, 2048, %s1580_s11, [#allocation6], %s1490_s13, %s1490_s13, %s1491_s15  }
  0x2a   : > { %s1325_s21 = scalar_lea.hbm %s1833_s3, 2048 }
  0x2b   : > { %p1326_p1 = scmp.ne.s32.totalorder %s1833_s3, %s1325_s21  ;;  %p1332_p10 = scmp.lt.u32.totalorder %s1325_s21, %s1833_s3 }
  0x2d   : > { %p1328_p2 = pnand %p1326_p1, %p1603_p13 }
  0x2f   : > { %p1329_p6 = pneg %p1328_p2 }
  0x31   : > { %p1334_p3 = pnand %p1332_p10, %p1329_p6 }
  0x33   : > { %1337 = shalt.err (!%p1334_p3)
}
  0x34   : > { %s1338_s11 = scalar_lea.vmem %s1591_s14, 2048  ;;  %p1346_p12 = scmp.lt.s32.totalorder %s1591_s14, %s1591_s14 }
  0x35   : > { %p1339_p5 = scmp.ne.s32.totalorder %s1591_s14, %s1338_s11  ;;  %p1347_p0 = scmp.lt.s32.totalorder %s1338_s11, %s1338_s11 }
  0x37   : > { %p1341_p7 = pnand %p1339_p5, %p1603_p13  ;;  %p1348_p1 = por %p1347_p0, %p1346_p12 }
  0x39   : > { %p1342_p9 = pneg %p1341_p7 }
  0x3b   : > { %p1349_p2 = pnand %p1348_p1, %p1342_p9 }
  0x3d   : > { %1352 = shalt.err (!%p1349_p2)
}
  0x3e   : > { %1238 = dma.hbm_to_vmem [thread:$0]  (!%p1587_p11), %s1833_s3, 2048, %s1591_s14, [#allocation6], %s1490_s13, %s1490_s13, %s1491_s15  }
  0x3f   : > { %s1353_s20 = scalar_lea.hbm %s1835_s5, 2048 }
  0x40   : > { %p1354_p6 = scmp.ne.s32.totalorder %s1835_s5, %s1353_s20  ;;  %p1360_p5 = scmp.lt.u32.totalorder %s1353_s20, %s1835_s5 }
  0x42   : > { %p1356_p10 = pnand %p1354_p6, %p1603_p13 }
  0x44   : > { %p1357_p3 = pneg %p1356_p10 }
  0x46   : > { %p1362_p7 = pnand %p1360_p5, %p1357_p3 }
  0x48   : > { %1365 = shalt.err (!%p1362_p7)
}
  0x49   : > { %s1366_s11 = scalar_lea.vmem %s253_s16, 2048  ;;  %p1374_p1 = scmp.lt.s32.totalorder %s253_s16, %s253_s16 }
  0x4a   : > { %p1367_p9 = scmp.ne.s32.totalorder %s253_s16, %s1366_s11  ;;  %p1375_p2 = scmp.lt.s32.totalorder %s1366_s11, %s1366_s11 }
  0x4c   : > { %p1369_p12 = pnand %p1367_p9, %p1603_p13  ;;  %p1376_p4 = por %p1375_p2, %p1374_p1 }
  0x4e   : > { %p1370_p0 = pneg %p1369_p12 }
  0x50   : > { %p1377_p8 = pnand %p1376_p4, %p1370_p0 }
  0x52   : > { %1380 = shalt.err (!%p1377_p8)
}
  0x53   : > { %1241 = dma.hbm_to_vmem [thread:$0]  (!%p1587_p11), %s1835_s5, 2048, %s253_s16, [#allocation9], %s1490_s13, %s1490_s13, %s1491_s15  }
  0x54   : > { %s1676_s22 = sadd.s32 1, %s1485_s27   ;;  %s32_s17 = sadd.s32 1, %s1481_s26 }
  0x55   : > { %s29_s12 = ssub.s32 %s1485_s27, %s1676_s22  ;;  %p39_p8 = scmp.ne.s32.totalorder %s1481_s26, %s1477_s25 }
  0x56   : > { %p30_p4 = scmp.eq.s32.totalorder %s29_s12, 0  ;;  %p40_p13 = scmp.eq.s32.totalorder %s1485_s27, 0 }
  0x57   : > { %p1253_p6 = scmp.lt.s32.totalorder %s1485_s27, 2  ;;  %p1848_p3 = scmp.eq.s32.totalorder %s1557_s28, 1 }
  0x58   : > { %s1686_s18 = scalar_select %p30_p4, %s1481_s26, %s32_s17  }
  0x59   : > { %p41_p10 = por %p40_p13, %p39_p8  ;;  %p1690_p5 = por %p1848_p3, %p39_p8 }
  0x5a   : > { %s269_s20 = sand.u32 1, %s1481_s26   ;;  %s898_s21 = sshll.u32 %s1485_s27, 10 }
  0x5b   : > { %s881_s16 = sshll.u32 %s269_s20, 6  ;;  %s1699_s10 = scalar_lea.hbm %s1830_s0, %s898_s21 }
  0x5c   : > { %s273_s11 = scalar_lea.vmem [#allocation2], %s881_s16  ;;  %p1701_p11 = pnand %p1253_p6, %p41_p10 }
  0x5d   : > { %s280_s14 = sshll.u32 %s273_s11, 4  ;;  %s1707_s12 = scalar_lea.sflag [#allocation3], %s269_s20  ;;  %s1705_s14 = int_to_ptr.vmem [resolvable:$true] %s280_s14 }
  0x5e   : > { %s1381_s17 = scalar_lea.hbm %s1699_s10, 1024  ;;  %p1383_p9 = pneg %p1701_p11 }
  0x5f   : > { %p1382_p7 = scmp.ne.s32.totalorder %s1699_s10, %s1381_s17  ;;  %s1386_s23 = scalar_lea.hbm %s1830_s0, 2048 }
  0x60   : > { %p1387_p1 = scmp.lt.u32.totalorder %s1699_s10, %s1830_s0  ;;  %p1388_p2 = scmp.lt.u32.totalorder %s1386_s23, %s1381_s17 }
  0x61   : > { %p1384_p12 = pnand %p1383_p9, %p1382_p7  ;;  %p1390_p8 = scmp.lt.u32.totalorder %s1381_s17, %s1699_s10 }
  0x62   : > { %p1389_p4 = por %p1388_p2, %p1387_p1 }
  0x63   : > { %p1385_p0 = pneg %p1384_p12 }
  0x64   : > { %p1391_p13 = por %p1390_p8, %p1389_p4 }
  0x66   : > { %p1392_p6 = pnand %p1391_p13, %p1385_p0 }
  0x68   : > { %1395 = shalt.err (!%p1392_p6)
}
  0x69   : > { %s1396_s20 = scalar_lea.vmem %s1705_s14, 1024  ;;  %s1492_s21 = smov [#allocation2]  }
  0x6a   : > { %p1397_p10 = scmp.ne.s32.totalorder %s1705_s14, %s1396_s20  ;;  %s1401_s16 = sshll.u32 %s1492_s21, 4  ;;  %s1402_s16 = int_to_ptr.vmem [resolvable:$false] %s1401_s16 }
  0x6b   : > { %s1403_s29 = scalar_lea.vmem %s1402_s16, 2048  ;;  %p1404_p12 = scmp.lt.s32.totalorder %s1705_s14, %s1402_s16 }
  0x6c   : > { %p1399_p3 = pnand %p1397_p10, %p1383_p9  ;;  %p1405_p1 = scmp.lt.s32.totalorder %s1403_s29, %s1396_s20 }
  0x6e   : > { %p1400_p7 = pneg %p1399_p3  ;;  %p1406_p2 = por %p1405_p1, %p1404_p12 }
  0x70   : > { %p1407_p4 = pnand %p1406_p2, %p1400_p7 }
  0x72   : > { %1410 = shalt.err (!%p1407_p4)
}
  0x73   : > { %1245 = dma.hbm_to_vmem [thread:$0]  (!%p1701_p11), %s1699_s10, 1024, %s1705_s14, %s1707_s12, %s1490_s13, %s1490_s13, %s1491_s15  }
  0x74   : > { %p1851_p9 = scmp.ne.s32.totalorder %s1845_s9, 0 }
  0x75   : > { %s1741_s17 = sand.u32 (!%p1851_p9), 1, %s1477_s25   ;;  %p1852_p0 = scmp.ne.s32.totalorder (!%p1851_p9), %s1842_s30, 0 }
  0x76   : > { %292 = sbr.rel (%p1851_p9) target bundleno = 846 (0x34e), region = 48  ;;  %s885_s23 = sshll.u32 (!%p1851_p9), %s1741_s17, 6 }
  0x77   : > { %s295_s11 = scalar_lea.sflag (!%p1851_p9), [#allocation3], %s1741_s17  ;;  %s1747_s8 = scalar_lea.vmem (!%p1851_p9), [#allocation2], %s885_s23 }
  0x7d   : > { %1456 = dma.done.wait (%p1852_p0), %s295_s11, 1024  }
  0x7e   : > { %1458 = vsyncadd (%p1852_p0), %s295_s11, 4294966272  ;;  %p1853_p11 = scmp.eq.s32.totalorder %s1557_s28, 0 }
  0x80   : > { %1460 = dma.done.wait (%p1853_p11), [#allocation6], 4096   ;;  %p1854_p8 = pmov %p1853_p11 }
  0x82   : > { %1462 = vsyncadd (%p1854_p8), [#allocation6], 4294963200  ;;  %p1855_p13 = pmov %p1854_p8 }
  0x83   : > { %p1856_p6 = pmov %p1854_p8 }
  0x84   : > { %1464 = dma.done.wait (%p1855_p13), [#allocation9], 2048  }
  0x85   : > { %1466 = vsyncadd (%p1856_p6), [#allocation9], 4294965248  ;;  %v351_v0 = vld [vmem:[#allocation5] sm:$0xff]  ;;  %v352_v1 = vld [vmem:[#allocation5 + $0x8] sm:$0xff]  ;;  %s340_s12 = scalar_lea.vmem [#allocation10], %s885_s23  ;;  %s899_s21 = sshll.u32 %s1557_s28, 10 }
  0x86   : > { %v353_v2 = vld [vmem:[#allocation5 + $0x10] sm:$0xff]  ;;  %v1104_v3 = vpack.c.bf16 %v352_v1, %v351_v0  ;;  %v354_v4 = vld [vmem:[#allocation5 + $0x18] sm:$0xff]  ;;  %v355_v6 = vld [vmem:[#allocation5 + $0x20] sm:$0xff]  ;;  %s773_s20 = sshll.u32 %s340_s12, 4  ;;  %s1786_s23 = scalar_lea.hbm %s1837_s7, %s899_s21  ;;  %s1781_s20 = int_to_ptr.vmem [resolvable:$true] %s773_s20 }
  0x87   : > { %v1108_v5 = vpack.c.bf16 %v354_v4, %v353_v2  ;;  %v356_v7 = vld [vmem:[#allocation5 + $0x28] sm:$0xff]  ;;  %v343_v9 = vld [vmem:[%s1747_s8] sm:$0xff]  ;;  %v357_v10 = vld [vmem:[#allocation5 + $0x30] sm:$0xff]  ;;  %s760_s11 = scalar_lea.sflag [#allocation4], %s1741_s17  ;;  %s1411_s28 = scalar_lea.vmem %s1781_s20, 1024 }
  0x88   : > { %1105 = vmatprep.subr.bf16.mxu0 %v1104_v3  ;;  %v1112_v8 = vpack.c.bf16 %v356_v7, %v355_v6  ;;  %v358_v11 = vld [vmem:[#allocation5 + $0x38] sm:$0xff]  ;;  %1004 = vmatprep.mubr.f32.mxu0 %v343_v9  ;;  %v487_v12 = vld [vmem:[#allocation7] sm:$0xff]  ;;  %v488_v13 = vld [vmem:[#allocation7 + $0x8] sm:$0xff]  ;;  %p1412_p10 = scmp.ne.s32.totalorder %s1781_s20, %s1411_s28 }
  0x89   : > { %1107 = vmatpush3.bf16.msra.mxu0 %v1104_v3  ;;  %v489_v14 = vld [vmem:[#allocation7 + $0x10] sm:$0xff]  ;;  %v1116_v15 = vpack.c.bf16 %v358_v11, %v357_v10  ;;  %v359_v16 = vld [vmem:[#allocation5 + $0x40] sm:$0xff]  ;;  %v1136_v17 = vpack.c.bf16 %v488_v13, %v487_v12  ;;  %v490_v18 = vld [vmem:[#allocation7 + $0x18] sm:$0xff] }
  0x8a   : > { %1109 = vmatprep.subr.bf16.mxu0 %v1108_v5  ;;  %v360_v19 = vld [vmem:[#allocation5 + $0x48] sm:$0xff]  ;;  %v1140_v20 = vpack.c.bf16 %v490_v18, %v489_v14  ;;  %v491_v21 = vld [vmem:[#allocation7 + $0x20] sm:$0xff]  ;;  %v361_v24 = vld [vmem:[#allocation5 + $0x50] sm:$0xff]  ;;  %p1413_p3 = pnand %p1412_p10, %p1690_p5 }
  0x8b   : > { %v492_v22 = vld [vmem:[#allocation7 + $0x28] sm:$0xff]  ;;  %1137 = vmatprep.subr.bf16.mxu1 %v1136_v17  ;;  %v1120_v23 = vpack.c.bf16 %v360_v19, %v359_v16  ;;  %v362_v26 = vld [vmem:[#allocation5 + $0x58] sm:$0xff]  ;;  %v493_v27 = vld [vmem:[#allocation7 + $0x30] sm:$0xff] }
  0x8c   : > { %1139 = vmatpush3.bf16.msra.mxu1 %v1136_v17  ;;  %v1144_v25 = vpack.c.bf16 %v492_v22, %v491_v21  ;;  %v494_v28 = vld [vmem:[#allocation7 + $0x38] sm:$0xff]  ;;  %v1124_v29 = vpack.c.bf16 %v362_v26, %v361_v24  ;;  %v363_v30 = vld [vmem:[#allocation5 + $0x60] sm:$0xff]  ;;  %v364_v32 = vld [vmem:[#allocation5 + $0x68] sm:$0xff]  ;;  %p1414_p7 = pneg %p1413_p3 }
  0x8d   : > { %1111 = vmatpush3.bf16.msra.mxu0 %v1108_v5  ;;  %1141 = vmatprep.subr.bf16.mxu1 %v1140_v20  ;;  %v1148_v31 = vpack.c.bf16 %v494_v28, %v493_v27  ;;  %v495_v33 = vld [vmem:[#allocation7 + $0x40] sm:$0xff]  ;;  %v496_v34 = vld [vmem:[#allocation7 + $0x48] sm:$0xff]  ;;  %v1128_v35 = vpack.c.bf16 %v364_v32, %v363_v30  ;;  %v365_v36 = vld [vmem:[#allocation5 + $0x70] sm:$0xff] }
  0x8e   : > { %1113 = vmatprep.subr.bf16.mxu0 %v1112_v8  ;;  %v1152_v37 = vpack.c.bf16 %v496_v34, %v495_v33  ;;  %v366_v38 = vld [vmem:[#allocation5 + $0x78] sm:$0xff]  ;;  %v497_v39 = vld [vmem:[#allocation7 + $0x50] sm:$0xff]  ;;  %v499_v43 = vld [vmem:[#allocation7 + $0x60] sm:$0xff] }
  0x8f   : > { %v498_v40 = vld [vmem:[#allocation7 + $0x58] sm:$0xff]  ;;  %v1132_v41 = vpack.c.bf16 %v366_v38, %v365_v36  ;;  %v500_v44 = vld [vmem:[#allocation7 + $0x68] sm:$0xff]  ;;  %v345_v47 = vld [vmem:[%s1747_s8 + $0x10] sm:$0xff] }
  0x90   : > { %1143 = vmatpush3.bf16.msra.mxu1 %v1140_v20  ;;  %v1156_v42 = vpack.c.bf16 %v498_v40, %v497_v39  ;;  %v1160_v45 = vpack.c.bf16 %v500_v44, %v499_v43  ;;  %v344_v46 = vld [vmem:[%s1747_s8 + $0x8] sm:$0xff]  ;;  %v346_v48 = vld [vmem:[%s1747_s8 + $0x18] sm:$0xff]  ;;  %v347_v49 = vld [vmem:[%s1747_s8 + $0x20] sm:$0xff] }
  0x91   : > { %1115 = vmatpush3.bf16.msra.mxu0 %v1112_v8  ;;  %1145 = vmatprep.subr.bf16.mxu1 %v1144_v25  ;;  %v348_v50 = vld [vmem:[%s1747_s8 + $0x28] sm:$0xff]  ;;  %v349_v51 = vld [vmem:[%s1747_s8 + $0x30] sm:$0xff]  ;;  %v350_v52 = vld [vmem:[%s1747_s8 + $0x38] sm:$0xff]  ;;  %s1493_s8 = smov [#allocation10]  }
  0x92   : > { %1117 = vmatprep.subr.bf16.mxu0 %v1116_v15  ;;  %v501_v53 = vld [vmem:[#allocation7 + $0x70] sm:$0xff]  ;;  %v502_v54 = vld [vmem:[#allocation7 + $0x78] sm:$0xff]  ;;  %v623_v56 = vld [vmem:[#allocation8] sm:$0xff]  ;;  %s1415_s30 = sshll.u32 %s1493_s8, 4  ;;  %s1416_s30 = int_to_ptr.vmem [resolvable:$false] %s1415_s30 }
  0x93   : > { %v1164_v55 = vpack.c.bf16 %v502_v54, %v501_v53  ;;  %v624_v57 = vld [vmem:[#allocation8 + $0x8] sm:$0xff]  ;;  %v625_v58 = vld [vmem:[#allocation8 + $0x10] sm:$0xff]  ;;  %v626_v60 = vld [vmem:[#allocation8 + $0x18] sm:$0xff]  ;;  %s1417_s9 = scalar_lea.vmem %s1416_s30, 2048  ;;  %p1418_p12 = scmp.lt.s32.totalorder %s1781_s20, %s1416_s30 }
  0x94   : > { %1147 = vmatpush3.bf16.msra.mxu1 %v1144_v25  ;;  %v1168_v59 = vpack.c.bf16 %v624_v57, %v623_v56  ;;  %v1172_v61 = vpack.c.bf16 %v626_v60, %v625_v58  ;;  %v627_v62 = vld [vmem:[#allocation8 + $0x20] sm:$0xff]  ;;  %v628_v63 = vld [vmem:[#allocation8 + $0x28] sm:$0xff]  ;;  %v629_v1 = vld [vmem:[#allocation8 + $0x30] sm:$0xff]  ;;  %p1419_p1 = scmp.lt.s32.totalorder %s1417_s9, %s1411_s28 }
  0x95   : > { %1119 = vmatpush3.bf16.msra.mxu0 %v1116_v15  ;;  %1149 = vmatprep.subr.bf16.mxu1 %v1148_v31  ;;  %v1176_v0 = vpack.c.bf16 %v628_v63, %v627_v62  ;;  %v630_v2 = vld [vmem:[#allocation8 + $0x38] sm:$0xff]  ;;  %v631_v4 = vld [vmem:[#allocation8 + $0x40] sm:$0xff]  ;;  %v632_v5 = vld [vmem:[#allocation8 + $0x48] sm:$0xff] }
  0x96   : > { %1121 = vmatprep.subr.bf16.mxu0 %v1120_v23  ;;  %v1180_v3 = vpack.c.bf16 %v630_v2, %v629_v1  ;;  %v1184_v6 = vpack.c.bf16 %v632_v5, %v631_v4  ;;  %v633_v7 = vld [vmem:[#allocation8 + $0x50] sm:$0xff]  ;;  %v634_v8 = vld [vmem:[#allocation8 + $0x58] sm:$0xff]  ;;  %v635_v10 = vld [vmem:[#allocation8 + $0x60] sm:$0xff]  ;;  %p1420_p2 = por %p1419_p1, %p1418_p12 }
  0x97   : > { %v1188_v9 = vpack.c.bf16 %v634_v8, %v633_v7  ;;  %v636_v11 = vld [vmem:[#allocation8 + $0x68] sm:$0xff]  ;;  %v890_v13 = vld [vmem:[%s1832_s2] ss:$0 sm:$0xff]  ;;  %v637_v38 = vld [vmem:[#allocation8 + $0x70] sm:$0xff] }
  0x98   : > { %1151 = vmatpush3.bf16.msra.mxu1 %v1148_v31  ;;  %v1192_v12 = vpack.c.bf16 %v636_v11, %v635_v10  ;;  %v638_v39 = vld [vmem:[#allocation8 + $0x78] sm:$0xff]  ;;  %v892_v2 = vld [vmem:[%s1836_s6] ss:$0 sm:$0xff]  ;;  %p1421_p4 = pnand %p1420_p2, %p1414_p7 }
  0x99   : > { %1123 = vmatpush3.bf16.msra.mxu0 %v1120_v23  ;;  %1153 = vmatprep.subr.bf16.mxu1 %v1152_v37  ;;  %v1196_v40 = vpack.c.bf16 %v638_v39, %v637_v38 }
  0x9a   : > { %1125 = vmatprep.subr.bf16.mxu0 %v1124_v29 }
  0x9c   : > { %1155 = vmatpush3.bf16.msra.mxu1 %v1152_v37 }
  0x9d   : > { %1127 = vmatpush3.bf16.msra.mxu0 %v1124_v29  ;;  %1157 = vmatprep.subr.bf16.mxu1 %v1156_v42 }
  0x9e   : > { %1129 = vmatprep.subr.bf16.mxu0 %v1128_v35 }
  0xa0   : > { %1159 = vmatpush3.bf16.msra.mxu1 %v1156_v42 }
  0xa1   : > { %1131 = vmatpush3.bf16.msra.mxu0 %v1128_v35  ;;  %1161 = vmatprep.subr.bf16.mxu1 %v1160_v45 }
  0xa2   : > { %1133 = vmatprep.subr.bf16.mxu0 %v1132_v41 }
  0xa4   : > { %1163 = vmatpush3.bf16.msra.mxu1 %v1160_v45 }
  0xa5   : > { %1135 = vmatpush3.bf16.msra.mxu0 %v1132_v41  ;;  %1165 = vmatprep.subr.bf16.mxu1 %v1164_v55  ;;  %v891_v41 = vld [vmem:[%s1834_s4] ss:$0 sm:$0xff] }
  0xa6   : > { %1169 = vmatprep.subr.bf16.mxu0 %v1168_v59 }
  0xa8   : > { %1005 = vmatmul.mubr.f32.vlgmr.msra.gmra.mrb[0].mxu0 %v344_v46  ;;  %1167 = vmatpush3.bf16.msra.mxu1 %v1164_v55 }
  0xa9   : > { %1007 = vmatprep.mubr.f32.mxu0 %v345_v47  ;;  %1200 = vmatprep.subr.bf16.mxu1 %v1168_v59 }
  0xaa   : > { %1171 = vmatpush3.bf16.msra.mxu0 %v1168_v59 }
  0xab   : > { %1173 = vmatprep.subr.bf16.mxu0 %v1172_v61 }
  0xac   : > { %1008 = vmatmul.mubr.f32.gmra.mrb[2].mxu0 %v346_v48 }
  0xad   : > { %1010 = vmatprep.mubr.f32.mxu0 %v347_v49 }
  0xae   : > { %1175 = vmatpush3.bf16.msra.mxu0 %v1172_v61 }
  0xaf   : > { %1177 = vmatprep.subr.bf16.mxu0 %v1176_v0 }
  0xb0   : > { %1011 = vmatmul.mubr.f32.gmra.mrb[4].mxu0 %v348_v50 }
  0xb1   : > { %1013 = vmatprep.mubr.f32.mxu0 %v349_v51 }
  0xb2   : > { %1179 = vmatpush3.bf16.msra.mxu0 %v1176_v0 }
  0xb3   : > { %1181 = vmatprep.subr.bf16.mxu0 %v1180_v3 }
  0xb4   : > { %1014 = vmatmul.mubr.f32.gmra.mrb[6].mxu0 %v350_v52 }
  0xb6   : > { %1183 = vmatpush3.bf16.msra.mxu0 %v1180_v3 }
  0xb7   : > { %1185 = vmatprep.subr.bf16.mxu0 %v1184_v6 }
  0xba   : > { %1187 = vmatpush3.bf16.msra.mxu0 %v1184_v6 }
  0xbb   : > { %1189 = vmatprep.subr.bf16.mxu0 %v1188_v9 }
  0xbe   : > { %1191 = vmatpush3.bf16.msra.mxu0 %v1188_v9 }
  0xbf   : > { %1193 = vmatprep.subr.bf16.mxu0 %v1192_v12 }
  0xc2   : > { %1195 = vmatpush3.bf16.msra.mxu0 %v1192_v12 }
  0xc3   : > { %1197 = vmatprep.subr.bf16.mxu0 %v1196_v40 }
  0xc6   : > { %1199 = vmatpush3.bf16.msra.mxu0 %v1196_v40 }
 0x17b   : > { %v1006_v14 = vpop.f32.mrb[0].mxu0 }
 0x17c   : > { %v446_v15 = vadd.f32 %v1006_v14, %v890_v13  ;;  %v440_v16 = vpop.f32.mrb[1].mxu0 }
 0x17d   : > { %v441_v17 = vadd.f32 %v890_v13, %v440_v16 }
 0x17e   : > { %v480_v20 = vmax.f32 %v446_v15, 0.0 }
 0x17f   : > { %v1009_v18 = vpop.f32.mrb[2].mxu0  ;;  %v479_v19 = vmax.f32 %v441_v17, 0.0 }
 0x180   : > { %v456_v21 = vadd.f32 %v1009_v18, %v890_v13  ;;  %v450_v22 = vpop.f32.mrb[3].mxu0 }
 0x181   : > { %v451_v23 = vadd.f32 %v890_v13, %v450_v22  ;;  %1048 = vmatprep.mubr.f32.mxu1 %v479_v19 }
 0x182   : > { %1049 = vmatmul.mubr.f32.vlgmr.msra.gmra.mrb[0].mxu1 %v480_v20  ;;  %v482_v26 = vmax.f32 %v456_v21, 0.0 }
 0x183   : > { %v481_v24 = vmax.f32 %v451_v23, 0.0  ;;  %v1012_v25 = vpop.f32.mrb[4].mxu0  ;;  %1208 = vmatpush3.bf16.msra.mxu1 %v1168_v59 }
 0x184   : > { %v466_v27 = vadd.f32 %v1012_v25, %v890_v13  ;;  %v460_v28 = vpop.f32.mrb[5].mxu0  ;;  %1201 = vmatprep.subr.bf16.mxu1 %v1172_v61 }
 0x185   : > { %v461_v29 = vadd.f32 %v890_v13, %v460_v28  ;;  %1051 = vmatprep.mubr.f32.mxu1 %v481_v24 }
 0x186   : > { %1052 = vmatmul.mubr.f32.gmra.mrb[2].mxu1 %v482_v26  ;;  %v484_v32 = vmax.f32 %v466_v27, 0.0 }
 0x187   : > { %v483_v30 = vmax.f32 %v461_v29, 0.0  ;;  %v1015_v31 = vpop.f32.mrb[6].mxu0  ;;  %1209 = vmatpush3.bf16.msra.mxu1 %v1172_v61 }
 0x188   : > { %v476_v33 = vadd.f32 %v1015_v31, %v890_v13  ;;  %v470_v34 = vpop.f32.mrb[7].mxu0  ;;  %1202 = vmatprep.subr.bf16.mxu1 %v1176_v0 }
 0x189   : > { %v471_v35 = vadd.f32 %v890_v13, %v470_v34  ;;  %1054 = vmatprep.mubr.f32.mxu1 %v483_v30 }
 0x18a   : > { %1055 = vmatmul.mubr.f32.gmra.mrb[4].mxu1 %v484_v32  ;;  %v486_v37 = vmax.f32 %v476_v33, 0.0 }
 0x18b   : > { %v485_v36 = vmax.f32 %v471_v35, 0.0  ;;  %1210 = vmatpush3.bf16.msra.mxu1 %v1176_v0 }
 0x18c   : > { %1203 = vmatprep.subr.bf16.mxu1 %v1180_v3 }
 0x18d   : > { %1057 = vmatprep.mubr.f32.mxu1 %v485_v36 }
 0x18e   : > { %1058 = vmatmul.mubr.f32.gmra.mrb[6].mxu1 %v486_v37 }
 0x18f   : > { %1211 = vmatpush3.bf16.msra.mxu1 %v1180_v3 }
 0x190   : > { %1204 = vmatprep.subr.bf16.mxu1 %v1184_v6 }
 0x193   : > { %1212 = vmatpush3.bf16.msra.mxu1 %v1184_v6 }
 0x194   : > { %1205 = vmatprep.subr.bf16.mxu1 %v1188_v9 }
 0x197   : > { %1213 = vmatpush3.bf16.msra.mxu1 %v1188_v9 }
 0x198   : > { %1206 = vmatprep.subr.bf16.mxu1 %v1192_v12 }
 0x19b   : > { %1214 = vmatpush3.bf16.msra.mxu1 %v1192_v12 }
 0x19c   : > { %1207 = vmatprep.subr.bf16.mxu1 %v1196_v40 }
 0x19f   : > { %1215 = vmatpush3.bf16.msra.mxu1 %v1196_v40 }
 0x255   : > { %v1050_v42 = vpop.f32.mrb[0].mxu1 }
 0x256   : > { %v582_v43 = vadd.f32 %v1050_v42, %v891_v41  ;;  %v576_v44 = vpop.f32.mrb[1].mxu1 }
 0x257   : > { %v577_v45 = vadd.f32 %v891_v41, %v576_v44 }
 0x258   : > { %v616_v48 = vmax.f32 %v582_v43, 0.0 }
 0x259   : > { %v615_v46 = vmax.f32 %v577_v45, 0.0  ;;  %v1053_v47 = vpop.f32.mrb[2].mxu1 }
 0x25a   : > { %v592_v49 = vadd.f32 %v1053_v47, %v891_v41  ;;  %v586_v50 = vpop.f32.mrb[3].mxu1 }
 0x25b   : > { %v587_v51 = vadd.f32 %v891_v41, %v586_v50  ;;  %1092 = vmatprep.mubr.f32.mxu0 %v615_v46 }
 0x25c   : > { %1093 = vmatmul.mubr.f32.vlgmr.msra.gmra.mrb[8].mxu0 %v616_v48  ;;  %v618_v54 = vmax.f32 %v592_v49, 0.0 }
 0x25d   : > { %v617_v52 = vmax.f32 %v587_v51, 0.0  ;;  %v1056_v53 = vpop.f32.mrb[4].mxu1 }
 0x25e   : > { %v602_v55 = vadd.f32 %v1056_v53, %v891_v41  ;;  %v596_v56 = vpop.f32.mrb[5].mxu1 }
 0x25f   : > { %v597_v57 = vadd.f32 %v891_v41, %v596_v56  ;;  %1095 = vmatprep.mubr.f32.mxu0 %v617_v52 }
 0x260   : > { %1096 = vmatmul.mubr.f32.gmra.mrb[10].mxu0 %v618_v54  ;;  %v620_v60 = vmax.f32 %v602_v55, 0.0 }
 0x261   : > { %v619_v58 = vmax.f32 %v597_v57, 0.0  ;;  %v1059_v59 = vpop.f32.mrb[6].mxu1 }
 0x262   : > { %v612_v61 = vadd.f32 %v1059_v59, %v891_v41  ;;  %v606_v62 = vpop.f32.mrb[7].mxu1 }
 0x263   : > { %v607_v63 = vadd.f32 %v891_v41, %v606_v62  ;;  %1098 = vmatprep.mubr.f32.mxu1 %v619_v58 }
 0x264   : > { %1099 = vmatmul.mubr.f32.vlgmr.msra.gmra.mrb[8].mxu1 %v620_v60  ;;  %v622_v1 = vmax.f32 %v612_v61, 0.0 }
 0x265   : > { %v621_v0 = vmax.f32 %v607_v63, 0.0 }
 0x267   : > { %1101 = vmatprep.mubr.f32.mxu1 %v621_v0 }
 0x268   : > { %1102 = vmatmul.mubr.f32.gmra.mrb[10].mxu1 %v622_v1 }
 0x32f   : > { %v1094_v3 = vpop.f32.mrb[8].mxu0 }
 0x330   : > { %v718_v4 = vadd.f32 %v1094_v3, %v892_v2  ;;  %v712_v5 = vpop.f32.mrb[9].mxu0 }
 0x331   : > { %v713_v6 = vadd.f32 %v892_v2, %v712_v5 }
 0x332   : > { %752 = vst [vmem:[%s340_s12 + $0x8] sm:$0xff] %v718_v4 }
 0x333   : > { %751 = vst [vmem:[%s340_s12] sm:$0xff] %v713_v6  ;;  %v1097_v7 = vpop.f32.mrb[10].mxu0 }
 0x334   : > { %v728_v8 = vadd.f32 %v1097_v7, %v892_v2  ;;  %v722_v9 = vpop.f32.mrb[11].mxu0 }
 0x335   : > { %v723_v10 = vadd.f32 %v892_v2, %v722_v9 }
 0x336   : > { %754 = vst [vmem:[%s340_s12 + $0x18] sm:$0xff] %v728_v8 }
 0x337   : > { %753 = vst [vmem:[%s340_s12 + $0x10] sm:$0xff] %v723_v10  ;;  %v1100_v11 = vpop.f32.mrb[8].mxu1 }
 0x338   : > { %v738_v12 = vadd.f32 %v1100_v11, %v892_v2  ;;  %v732_v13 = vpop.f32.mrb[9].mxu1 }
 0x339   : > { %v733_v14 = vadd.f32 %v892_v2, %v732_v13 }
 0x33a   : > { %756 = vst [vmem:[%s340_s12 + $0x28] sm:$0xff] %v738_v12 }
 0x33b   : > { %755 = vst [vmem:[%s340_s12 + $0x20] sm:$0xff] %v733_v14  ;;  %v1103_v15 = vpop.f32.mrb[10].mxu1 }
 0x33c   : > { %v748_v16 = vadd.f32 %v1103_v15, %v892_v2  ;;  %v742_v17 = vpop.f32.mrb[11].mxu1 }
 0x33d   : > { %v743_v18 = vadd.f32 %v892_v2, %v742_v17 }
 0x33e   : > { %758 = vst [vmem:[%s340_s12 + $0x38] sm:$0xff] %v748_v16 }
 0x33f   : > { %757 = vst [vmem:[%s340_s12 + $0x30] sm:$0xff] %v743_v18 }
 0x340   : > { %1424 = shalt.err (!%p1421_p4)
}
 0x341   : > { %s1425_s13 = scalar_lea.hbm %s1786_s23, 1024  ;;  %s1429_s14 = scalar_lea.hbm %s1837_s7, 2048 }
 0x342   : > { %p1426_p9 = scmp.ne.s32.totalorder %s1786_s23, %s1425_s13  ;;  %p1430_p8 = scmp.lt.u32.totalorder %s1786_s23, %s1837_s7 }
 0x343   : > { %p1431_p13 = scmp.lt.u32.totalorder %s1429_s14, %s1425_s13  ;;  %p1433_p10 = scmp.lt.u32.totalorder %s1425_s13, %s1786_s23 }
 0x344   : > { %p1427_p0 = pnand %p1426_p9, %p1690_p5 }
 0x345   : > { %p1432_p6 = por %p1431_p13, %p1430_p8 }
 0x346   : > { %p1428_p11 = pneg %p1427_p0 }
 0x347   : > { %p1434_p3 = por %p1433_p10, %p1432_p6 }
 0x349   : > { %p1435_p7 = pnand %p1434_p3, %p1428_p11 }
 0x34b   : > { %1438 = shalt.err (!%p1435_p7)
}
 0x34c   : > { %s1494_s16 = smov 128   ;;  %s1495_s29 = smov 8  }
 0x34d   : > { %1230 = dma.vmem_to_hbm [thread:$0]  (%p1690_p5), %s1781_s20, 1024, %s1786_s23, %s760_s11, %s1494_s16, %s1494_s16, %s1495_s29  }
 0x34e PF: > { %s1857_s28 = sld [smem:[#allocation15_spill]]  ;;  %s788_s8 = sand.u32 1, %s1473_s24  }
 0x34f   : > { %p1859_p1 = scmp.ge.s32.totalorder %s1485_s27, 2  ;;  %s789_s30 = scalar_lea.sflag [#allocation4], %s788_s8 }
 0x354   : > { %p1858_p12 = scmp.ne.s32.totalorder %s1857_s28, 0 }
 0x356   : > { %p1247_p2 = pnand %p1859_p1, %p1858_p12 }
 0x358   : > { %1468 = dma.done.wait (!%p1247_p2), %s789_s30, 1024  }
 0x359   : > { %1470 = vsyncadd (!%p1247_p2), %s789_s30, 4294966272  ;;  %p22_p4 = scmp.ge.s32.totalorder %s1676_s22, 4   ;;  %s1860_s24 = smov %s1477_s25 }
 0x35a   : > { %s1861_s25 = smov %s1481_s26  ;;  %s1862_s26 = smov %s1686_s18 }
 0x35b   : > { %s1863_s27 = smov %s1676_s22  ;;  %24 = sbr.rel (!%p22_p4) target bundleno = 7 (0x7), region = 105 }
 0x362   :  { %794 = vsyncpa [#allocation3], 1 }
 0x363   :  { %796 = vsyncpa [#allocation3 + $0x1], 1 }
 0x364   :  { %797 = vsyncpa [#allocation6], 1 }
 0x365   :  { %798 = vsyncpa [#allocation9], 1 }
 0x366   :  { %799 = vsyncpa [#allocation4], 1 }
 0x367   :  { %801 = vsyncpa [#allocation4 + $0x1], 1 }

</bundles_post_ra>
